<compile_context>
chip_gen: v6e
topology: v6e:2x2x1
jax: 0.10.0
libtpu: 0.0.40
codegen_flags: <defaults>
</compile_context>

<pallas_src>
import jax
import jax.numpy as jnp
from jax.experimental import pallas as pl
from jax.experimental.pallas import tpu as pltpu


def _round_up(n, m):
    return ((n + m - 1) // m) * m


def _sigmoid_tanh(z):
    # sigmoid(z) == 0.5 * (tanh(z / 2) + 1): single EUP push per vreg.
    return 0.5 * (jnp.tanh(0.5 * z) + 1.0)


def mlp_kernel(xt_ref, w1_ref, b1_ref, w2_ref, b2_ref, o_ref):
    """One lane-dense batch tile (batch on the lane axis throughout).

    xt_ref: (D, TB)    input tile, transposed (batch on lanes)
    w1_ref: (H, D)     hidden_1 weight, torch (out, in) layout, resident
    b1_ref: (H, 1)     hidden_1 bias column, resident
    w2_ref: (H, 1)     output-layer weight column (torch (1, H) transposed)
    b2_ref: (1, 1)     output-layer bias scalar, SMEM
    o_ref:  (1, 1, TB) lane-dense output row for this tile
    """
    # Layer 1 on the MXU in NN form: (H, D) x (D, TB) -> (H, TB).
    # Batch stays on the lane axis; no transpose/relayout feeds the MXU.
    z = jax.lax.dot_general(
        w1_ref[...], xt_ref[...],
        dimension_numbers=(((1,), (0,)), ((), ())),
        preferred_element_type=jnp.float32,
    )
    h = _sigmoid_tanh(z + b1_ref[...])              # (H, TB) + (H, 1) bcast

    # Layer 2 (single output unit): VPU multiply + XLU sublane reduction
    # instead of an N=1 MXU matmul.  Result is already a lane-dense (1, TB).
    o = jnp.sum(h * w2_ref[...], axis=0, keepdims=True) + b2_ref[0, 0]
    o_ref[...] = _sigmoid_tanh(o)[None].astype(o_ref.dtype)


def classification_forward(x, w1, b1, w2, b2, *, block_b=8192,
                           matmul_dtype=jnp.float32):
    """Forward pass of `Classification` as a Pallas TPU kernel.

    x : (B, D) float32
    w1: (H, D)  b1: (H,)   -- torch nn.Linear(D, 2D) parameter layout (out, in)
    w2: (1, H)  b2: (1,)   -- torch nn.Linear(2D, 1) parameter layout
    returns: (B, 1) float32
    """
    B, D = x.shape
    H = w1.shape[0]

    # --- batch tile selection: always a multiple of 128 (lane-dense). -------
    tb = _round_up(min(block_b, B), 128)
    num_tiles = pl.cdiv(B, tb)
    if num_tiles == 1 and B > 256:
        # Keep >= 2 tiles so the "parallel" grid axis can shard across v7x's
        # two TensorCores (no-op on single-TC v5e/v6e).
        tb = _round_up(-(-B // 2), 128)
        num_tiles = pl.cdiv(B, tb)
    pad_b = num_tiles * tb

    # --- operand layouts -----------------------------------------------------
    # x streamed transposed (D, B): dense lane utilization of every x load.
    # TODO(synk): have the data producer emit (D, B) directly (or use
    # allow_input_fusion) so the wrapper-side transpose fuses away.
    xt = x.T.astype(matmul_dtype)                   # (D, B)
    if pad_b != B:
        xt = jnp.pad(xt, ((0, 0), (0, pad_b - B)))

    w1c = w1.astype(matmul_dtype)                   # (H, D)  resident
    b1c = b1.reshape(H, 1).astype(jnp.float32)      # (H, 1)  resident
    w2c = w2.reshape(H, 1).astype(jnp.float32)      # (H, 1)  == w2.T
    b2s = b2.reshape(1, 1).astype(jnp.float32)      # (1, 1)  SMEM scalar

    itemsize = jnp.dtype(matmul_dtype).itemsize
    cost = pl.CostEstimate(
        flops=2 * pad_b * D * H + 3 * pad_b * H,
        transcendentals=pad_b * (H + 1),
        bytes_accessed=(pad_b * D + H * D) * itemsize
        + (pad_b + 3 * H + 1) * 4,
    )

    out = pl.pallas_call(
        mlp_kernel,
        out_shape=jax.ShapeDtypeStruct((num_tiles, 1, tb), jnp.float32),
        grid=(num_tiles,),
        in_specs=[
            pl.BlockSpec((D, tb), lambda i: (0, i)),            # x^T: streamed
            pl.BlockSpec((H, D), lambda i: (0, 0)),             # W1: resident
            pl.BlockSpec((H, 1), lambda i: (0, 0)),             # b1: resident
            pl.BlockSpec((H, 1), lambda i: (0, 0)),             # w2: resident
            pl.BlockSpec(memory_space=pltpu.MemorySpace.SMEM),  # b2: scalar
        ],
        out_specs=pl.BlockSpec((1, 1, tb), lambda i: (i, 0, 0)),
        compiler_params=pltpu.CompilerParams(
            dimension_semantics=("parallel",),
        ),
        cost_estimate=cost,
    )(xt, w1c, b1c, w2c, b2s)

    # (num_tiles, 1, tb) -> (B, 1): wrapper-side layout plumbing only.
    return out.reshape(-1)[:B].reshape(B, 1)


def init_params(key, input_dim):
    """Deterministic init matching nn.Linear's (out, in) parameter layout."""
    hidden = 2 * input_dim
    k1, k2, k3, k4 = jax.random.split(key, 4)
    lim1 = 1.0 / jnp.sqrt(jnp.float32(input_dim))
    lim2 = 1.0 / jnp.sqrt(jnp.float32(hidden))
    w1 = jax.random.uniform(k1, (hidden, input_dim), jnp.float32, -lim1, lim1)
    b1 = jax.random.uniform(k2, (hidden,), jnp.float32, -lim1, lim1)
    w2 = jax.random.uniform(k3, (1, hidden), jnp.float32, -lim2, lim2)
    b2 = jax.random.uniform(k4, (1,), jnp.float32, -lim2, lim2)
    return w1, b1, w2, b2


def reference_forward(x, w1, b1, w2, b2):
    h = jax.nn.sigmoid(x @ w1.T + b1)
    return jax.nn.sigmoid(h @ w2.T + b2)


if __name__ == "__main__":
    key = jax.random.PRNGKey(0)
    kx, kx2, kp = jax.random.split(key, 3)

    input_dim = 16          # = train_data.shape[1] * 2 in the source script
    w1, b1, w2, b2 = init_params(kp, input_dim)

    # Case 1: tiny batch (single padded 128-row tile).
    batch = 8
    x = jax.random.normal(kx, (batch, input_dim), jnp.float32)
    out = jax.block_until_ready(classification_forward(x, w1, b1, w2, b2))
    ref = reference_forward(x, w1, b1, w2, b2)
    assert out.shape == (batch, 1)
    assert jnp.allclose(out, ref, atol=1e-5, rtol=1e-5)

    # Case 2: non-multiple batch -> split into >= 2 tiles (exercises the
    # pipelined / padded multi-tile path and the v7x 2-TC split heuristic).
    batch2 = 260
    x2 = jax.random.normal(kx2, (batch2, input_dim), jnp.float32)
    out2 = jax.block_until_ready(classification_forward(x2, w1, b1, w2, b2))
    ref2 = reference_forward(x2, w1, b1, w2, b2)
    assert out2.shape == (batch2, 1)
    assert jnp.allclose(out2, ref2, atol=1e-5, rtol=1e-5)

    # Case 3: bf16 x / W1 stream (v5e HBM-bandwidth saver); looser tolerance.
    out3 = jax.block_until_ready(
        classification_forward(x2, w1, b1, w2, b2, matmul_dtype=jnp.bfloat16))
    assert out3.shape == (batch2, 1)
    assert jnp.allclose(out3, ref2, atol=2e-2, rtol=2e-2)

    print("KERNEL_OK")
</pallas_src>

<mosaic_0001>
module attributes {stable_mosaic.version = 11 : i64} {
  func.func @mlp_kernel(%arg0: i32, %arg1: memref<16x128xf32, #tpu.memory_space<vmem>>, %arg2: memref<32x16xf32, #tpu.memory_space<vmem>>, %arg3: memref<32x1xf32, #tpu.memory_space<vmem>>, %arg4: memref<32x1xf32, #tpu.memory_space<vmem>>, %arg5: memref<1x1xf32, #tpu.memory_space<smem>>, %arg6: memref<1x1x128xf32, #tpu.memory_space<vmem>>) attributes {dimension_semantics = [#tpu.dimension_semantics<parallel>], iteration_bounds = array<i64: 1>, scalar_prefetch = 0 : i64, scratch_operands = 0 : i64, tpu.core_type = #tpu.core_type<tc>, window_params = [{transform_indices = @transform_0, window_bounds = array<i64: 16, 128>}, {pipeline_mode = #tpu.pipeline_mode<synchronous>, transform_indices = @transform_1, window_bounds = array<i64: 32, 16>}, {pipeline_mode = #tpu.pipeline_mode<synchronous>, transform_indices = @transform_2, window_bounds = array<i64: 32, 1>}, {pipeline_mode = #tpu.pipeline_mode<synchronous>, transform_indices = @transform_3, window_bounds = array<i64: 32, 1>}, {transform_indices = @transform_4, window_bounds = array<i64: 1, 1>}, {transform_indices = @transform_5, window_bounds = array<i64: 1, 1, 128>}]} {
    %c0 = arith.constant 0 : index
    %c0_0 = arith.constant 0 : index
    %0 = vector.load %arg2[%c0, %c0_0] : memref<32x16xf32, #tpu.memory_space<vmem>>, vector<32x16xf32>
    %c0_1 = arith.constant 0 : index
    %c0_2 = arith.constant 0 : index
    %1 = vector.load %arg1[%c0_1, %c0_2] : memref<16x128xf32, #tpu.memory_space<vmem>>, vector<16x128xf32>
    %cst = arith.constant dense<0.000000e+00> : vector<32x128xf32>
    %2 = tpu.matmul %0, %1, %cst {dimension_numbers = #tpu.dot_dimension_numbers<[1], [0], [0], [1], [0, 0, 1, 1], [], []>} : vector<32x16xf32>, vector<16x128xf32>, vector<32x128xf32> -> vector<32x128xf32>
    %c0_3 = arith.constant 0 : index
    %c0_4 = arith.constant 0 : index
    %3 = vector.load %arg3[%c0_3, %c0_4] : memref<32x1xf32, #tpu.memory_space<vmem>>, vector<32x1xf32>
    %4 = vector.broadcast %3 : vector<32x1xf32> to vector<32x128xf32>
    %5 = arith.addf %2, %4 : vector<32x128xf32>
    %cst_5 = arith.constant 5.000000e-01 : f32
    %6 = vector.broadcast %cst_5 : f32 to vector<32x128xf32>
    %7 = arith.mulf %6, %5 : vector<32x128xf32>
    %8 = math.tanh %7 : vector<32x128xf32>
    %cst_6 = arith.constant 1.000000e+00 : f32
    %9 = vector.broadcast %cst_6 : f32 to vector<32x128xf32>
    %10 = arith.addf %8, %9 : vector<32x128xf32>
    %cst_7 = arith.constant 5.000000e-01 : f32
    %11 = vector.broadcast %cst_7 : f32 to vector<32x128xf32>
    %12 = arith.mulf %11, %10 : vector<32x128xf32>
    %c0_8 = arith.constant 0 : index
    %c0_9 = arith.constant 0 : index
    %13 = vector.load %arg4[%c0_8, %c0_9] : memref<32x1xf32, #tpu.memory_space<vmem>>, vector<32x1xf32>
    %14 = vector.broadcast %13 : vector<32x1xf32> to vector<32x128xf32>
    %15 = arith.mulf %12, %14 : vector<32x128xf32>
    %cst_10 = arith.constant dense<0.000000e+00> : vector<128xf32>
    %16 = vector.multi_reduction <add>, %15, %cst_10 [0] : vector<32x128xf32> to vector<128xf32>
    %17 = vector.shape_cast %16 : vector<128xf32> to vector<1x128xf32>
    %c0_11 = arith.constant 0 : index
    %c0_12 = arith.constant 0 : index
    %18 = memref.load %arg5[%c0_11, %c0_12] : memref<1x1xf32, #tpu.memory_space<smem>>
    %19 = vector.broadcast %18 : f32 to vector<1x128xf32>
    %20 = arith.addf %17, %19 : vector<1x128xf32>
    %cst_13 = arith.constant 5.000000e-01 : f32
    %21 = vector.broadcast %cst_13 : f32 to vector<1x128xf32>
    %22 = arith.mulf %21, %20 : vector<1x128xf32>
    %23 = math.tanh %22 : vector<1x128xf32>
    %cst_14 = arith.constant 1.000000e+00 : f32
    %24 = vector.broadcast %cst_14 : f32 to vector<1x128xf32>
    %25 = arith.addf %23, %24 : vector<1x128xf32>
    %cst_15 = arith.constant 5.000000e-01 : f32
    %26 = vector.broadcast %cst_15 : f32 to vector<1x128xf32>
    %27 = arith.mulf %26, %25 : vector<1x128xf32>
    %28 = vector.shape_cast %27 : vector<1x128xf32> to vector<1x1x128xf32>
    %c0_16 = arith.constant 0 : index
    %c0_17 = arith.constant 0 : index
    %c0_18 = arith.constant 0 : index
    %29 = vector.load %arg6[%c0_16, %c0_17, %c0_18] : memref<1x1x128xf32, #tpu.memory_space<vmem>>, vector<1x1x128xf32>
    tpu.vector_store %arg6[%c0_16, %c0_17, %c0_18], %28 {strides = array<i32>} : memref<1x1x128xf32, #tpu.memory_space<vmem>>, vector<1x1x128xf32>,
    return
  }
  func.func @transform_0(%arg0: i32) -> (i32, i32) {
    %c0_i32 = arith.constant 0 : i32
    %c0_i32_0 = arith.constant 0 : i32
    return %c0_i32, %arg0 : i32, i32
  }
  func.func @transform_1(%arg0: i32) -> (i32, i32) {
    %c0_i32 = arith.constant 0 : i32
    %c0_i32_0 = arith.constant 0 : i32
    %c0_i32_1 = arith.constant 0 : i32
    return %c0_i32, %c0_i32_0 : i32, i32
  }
  func.func @transform_2(%arg0: i32) -> (i32, i32) {
    %c0_i32 = arith.constant 0 : i32
    %c0_i32_0 = arith.constant 0 : i32
    %c0_i32_1 = arith.constant 0 : i32
    return %c0_i32, %c0_i32_0 : i32, i32
  }
  func.func @transform_3(%arg0: i32) -> (i32, i32) {
    %c0_i32 = arith.constant 0 : i32
    %c0_i32_0 = arith.constant 0 : i32
    %c0_i32_1 = arith.constant 0 : i32
    return %c0_i32, %c0_i32_0 : i32, i32
  }
  func.func @transform_4(%arg0: i32) -> (i32, i32) {
    %c0_i32 = arith.constant 0 : i32
    %c0_i32_0 = arith.constant 0 : i32
    %c0_i32_1 = arith.constant 0 : i32
    return %c0_i32, %c0_i32_0 : i32, i32
  }
  func.func @transform_5(%arg0: i32) -> (i32, i32, i32) {
    %c0_i32 = arith.constant 0 : i32
    %c0_i32_0 = arith.constant 0 : i32
    %c0_i32_1 = arith.constant 0 : i32
    return %arg0, %c0_i32, %c0_i32_0 : i32, i32, i32
  }
}

</mosaic_0001>

<bundles_post_ra>
// kernel: tpu_custom_call.1
= control target key start
LH: loop header
LB: loop body
LE: loop exit
PB: predicated region body
PF: predicated region fallthrough
CT: control target
= control target key end

     0   :  { %vm52_vm0 = vcmask 130048   ;;  %s365_s0 = inlined_call_operand.vmem [shape: f32[16,128], index: 0, kind: input, shape index: {}]   ;;  %s366_s1 = inlined_call_operand.vmem [shape: f32[32,16], index: 1, kind: input, shape index: {}]   ;;  %s367_s2 = inlined_call_operand.vmem [shape: f32[32,1], index: 2, kind: input, shape index: {}]   ;;  %s368_s3 = inlined_call_operand.vmem [shape: f32[32,1], index: 3, kind: input, shape index: {}]   ;;  %s369_s4 = inlined_call_operand.<no memory space> [shape: f32[1,1], index: 4, kind: input, shape index: {}]   ;;  %s370_s5 = inlined_call_operand.hbm [shape: f32[1,1,128], index: 5, kind: output, shape index: {}]  }
   0x1   :  { %v27_v0 = vld [vmem:[%s365_s0 + $0x8] sm:$0xff]  ;;  %v26_v1 = vld [vmem:[%s365_s0] sm:$0xff]  ;;  %v24_v3 = vld [vmem:[%s366_s1 + $0x10] sm:$0xff] }
   0x2   :  { %235 = vmatprep.subr.mxu0 %v27_v0  ;;  %245 = vmatprep.subr.mxu1 %v27_v0  ;;  %v22_v2 = vld [vmem:[%s366_s1] sm:$0xff]  ;;  %v23_v4 = vld [vmem:[%s366_s1 + $0x8] sm:$0xff]  ;;  %v25_v5 = vld [vmem:[%s366_s1 + $0x18] sm:$0xff] }
   0x3   :  { %236 = vmatpush3.msra.mxu0 %v27_v0  ;;  %247 = vmatpush3.msra.mxu1 %v27_v0 }
   0x4   :  { %237 = vmatprep.subr.mxu0 %v26_v1  ;;  %246 = vmatprep.subr.mxu1 %v26_v1 }
   0x5   :  { %238 = vmatpush3.msra.mxu0 %v26_v1  ;;  %248 = vmatpush3.msra.mxu1 %v26_v1 }
   0x6   :  { %11 = vsyncpa [#allocation4], 0  ;;  %239 = vmatprep.mubr.msk.f32.mxu0 %vm52_vm0, %v22_v2  ;;  %242 = vmatprep.mubr.msk.f32.mxu1 %vm52_vm0, %v24_v3  ;;  %v28_v6 = vld [vmem:[%s367_s2] sm:$0xff]  ;;  %v30_v7 = vld [vmem:[%s367_s2 + $0x10] sm:$0xff]  ;;  %v285_v8 = vmov 0   ;;  %v204_v59 = vstv %s369_s4  ;;  %s286_s19 = smov [#allocation3]  }
   0x7   :  { %240 = vmatmul.mubr.msk.f32.vlgmr.msra.gmra.mxu0 %vm52_vm0, %v23_v4  ;;  %243 = vmatmul.mubr.msk.f32.vlgmr.msra.gmra.mxu1 %vm52_vm0, %v25_v5  ;;  %v29_v9 = vld [vmem:[%s367_s2 + $0x8] sm:$0xff]  ;;  %v31_v10 = vld [vmem:[%s367_s2 + $0x18] sm:$0xff]  ;;  %v166_v11 = vld [vmem:[%s368_s3] sm:$0xff]  ;;  %s217_s20 = sshll.u32 %s286_s19, 4  ;;  %s218_s20 = int_to_ptr.vmem [resolvable:$true] %s217_s20 }
   0x8   :  { %251 = vset.pattern.permute.xlu0 %v285_v8  ;;  %252 = vset.pattern.permute.xlu1 %v285_v8  ;;  %v167_v12 = vld [vmem:[%s368_s3 + $0x8] sm:$0xff]  ;;  %v168_v13 = vld [vmem:[%s368_s3 + $0x10] sm:$0xff]  ;;  %v169_v14 = vld [vmem:[%s368_s3 + $0x18] sm:$0xff]  ;;  %s263_s21 = scalar_lea.vmem %s218_s20, 16  ;;  %s267_s22 = scalar_lea.vmem %s218_s20, 32 }
   0x9   :  { %34 = vperm.xlu0 %251, %v28_v6   ;;  %44 = vperm.xlu1 %252, %v30_v7   ;;  %p264_p0 = scmp.ne.s32.totalorder %s218_s20, %s263_s21  ;;  %p268_p1 = scmp.lt.s32.totalorder %s218_s20, %s218_s20 }
   0xa   :  { %p269_p2 = scmp.lt.s32.totalorder %s267_s22, %s263_s21 }
   0xc   :  { %p270_p3 = por %p269_p2, %p268_p1 }
   0xd   :  { %39 = vperm.xlu0 %251, %v29_v9   ;;  %49 = vperm.xlu1 %252, %v31_v10  }
   0xe   :  { %p271_p4 = pnand %p270_p3, %p264_p0 }
  0x11   :  { %172 = vperm.xlu0 %251, %v166_v11   ;;  %177 = vperm.xlu1 %252, %v167_v12  }
  0x15   :  { %182 = vperm.xlu0 %251, %v168_v13   ;;  %187 = vperm.xlu1 %252, %v169_v14  }
  0x84   :  { %v35_v15 = vpop.permute.xlu0 %34  ;;  %v45_v16 = vpop.permute.xlu1 %44 }
  0x88   :  { %v40_v17 = vpop.permute.xlu0 %39  ;;  %v50_v18 = vpop.permute.xlu1 %49 }
  0x8c   :  { %v173_v35 = vpop.permute.xlu0 %172  ;;  %v178_v40 = vpop.permute.xlu1 %177 }
  0x90   :  { %v183_v47 = vpop.permute.xlu0 %182  ;;  %v188_v50 = vpop.permute.xlu1 %187 }
  0xc7   :  { %v241_v19 = vpop.f32.mrf.mxu0  ;;  %v244_v20 = vpop.f32.mrf.mxu1 }
  0xc8   :  { %v137_v21 = vadd.f32 %v241_v19, %v40_v17  ;;  %v147_v22 = vadd.f32 %v244_v20, %v50_v18 }
  0xc9   :  { %v131_v23 = vpop.f32.mrf.mxu0  ;;  %v141_v24 = vpop.f32.mrf.mxu1 }
  0xca   :  { %v151_v25 = vmul.f32 0.5, %v137_v21  ;;  %v153_v26 = vmul.f32 0.5, %v147_v22  ;;  %v132_v27 = vadd.f32 %v131_v23, %v35_v15  ;;  %v142_v28 = vadd.f32 %v141_v24, %v45_v16 }
  0xcc   :  { %253 = vtanh.f32 %v151_v25  ;;  %v150_v29 = vmul.f32 0.5, %v132_v27  ;;  %v152_v30 = vmul.f32 0.5, %v142_v28 }
  0xcd   :  { %255 = vtanh.f32 %v153_v26 }
  0xce   :  { %257 = vtanh.f32 %v150_v29 }
  0xcf   :  { %259 = vtanh.f32 %v152_v30 }
  0xd9   :  { %v254_v31 = vpop.eup %253 }
  0xda   :  { %v256_v32 = vpop.eup %255  ;;  %v159_v33 = vadd.f32 1.0, %v254_v31 }
  0xdb   :  { %v258_v34 = vpop.eup %257  ;;  %v161_v38 = vadd.f32 1.0, %v256_v32 }
  0xdc   :  { %v260_v36 = vpop.eup %259  ;;  %v163_v37 = vmul.f32 0.5, %v159_v33  ;;  %v158_v39 = vadd.f32 1.0, %v258_v34 }
  0xdd   :  { %v160_v41 = vadd.f32 1.0, %v260_v36  ;;  %v165_v45 = vmul.f32 0.5, %v161_v38 }
  0xde   :  { %v162_v42 = vmul.f32 0.5, %v158_v39  ;;  %v191_v44 = vmul.f32 %v178_v40, %v163_v37 }
  0xdf   :  { %v164_v43 = vmul.f32 0.5, %v160_v41  ;;  %v193_v51 = vmul.f32 %v188_v50, %v165_v45 }
  0xe0   :  { %v190_v46 = vmul.f32 %v173_v35, %v162_v42 }
  0xe1   :  { %v192_v49 = vmul.f32 %v183_v47, %v164_v43 }
  0xe2   :  { %v194_v48 = vadd.f32 %v191_v44, %v190_v46 }
  0xe4   :  { %v195_v52 = vadd.f32 %v194_v48, %v192_v49 }
  0xe6   :  { %v196_v53 = vadd.f32 %v195_v52, %v193_v51 }
  0xe8   :  { %v197_v54 = vrot.slane %v196_v53, 4 }
  0xea   :  { %v198_v55 = vadd.f32 %v197_v54, %v196_v53 }
  0xec   :  { %v199_v56 = vrot.slane %v198_v55, 2 }
  0xee   :  { %v200_v57 = vadd.f32 %v199_v56, %v198_v55 }
  0xf0   :  { %v201_v58 = vrot.slane %v200_v57, 1 }
  0xf2   :  { %v202_v60 = vadd.f32 %v201_v58, %v200_v57 }
  0xf4   :  { %v205_v61 = vadd.f32 %v204_v59, %v202_v60 }
  0xf6   :  { %v206_v62 = vmul.f32 0.5, %v205_v61 }
  0xf8   :  { %261 = vtanh.f32 %v206_v62 }
 0x105   :  { %v262_v63 = vpop.eup %261 }
 0x106   :  { %v208_v0 = vadd.f32 1.0, %v262_v63 }
 0x108   :  { %v209_v1 = vmul.f32 0.5, %v208_v0 }
 0x10a   :  { %210 = vst [vmem:[#allocation3] sm:$0x1] %v209_v1 }
 0x10b   :  { %274 = shalt.err (!%p271_p4)
}
 0x10c   :  { %220 = dma.vmem_to_hbm [thread:$0]  %s218_s20, 16, %s370_s5, [#allocation4]  }
 0x10d   :  { %283 = dma.done.wait [#allocation4], 16  }
 0x10e   :  { %284 = vsyncadd [#allocation4], 4294967280 }
 0x10f   :  { %224 = vsyncpa [#allocation4], 1 }

</bundles_post_ra>
